<compile_context>
chip_gen: v7x
topology: tpu7x:2x2x1
jax: 0.10.0
libtpu: 0.0.40
codegen_flags: <defaults>
</compile_context>

<pallas_src>
import jax
import jax.numpy as jnp
from jax.experimental import pallas as pl
from jax.experimental.pallas import tpu as pltpu

HIDDEN = 32
OUT_PAD = 128   # lane-dense output slab width (multiple of 128)
MAX_TM = 512    # rows per grid step (re-derived small enough for v7x VMEM)


def _mlp_kernel(x_ref,
                w1_ref, b1_ref,
                w2_ref, b2_ref,
                w3_ref, b3_ref,
                w4_ref, b4_ref,
                o_ref):
    # x tile + weights are bf16 (MXU-native); accumulate in f32 on the MXU,
    # bias-add + ReLU in f32 on the VPU.
    h = jnp.dot(x_ref[...], w1_ref[...], preferred_element_type=jnp.float32)
    h = jnp.maximum(h + b1_ref[...], 0.0)

    h = jnp.dot(h.astype(jnp.bfloat16), w2_ref[...], preferred_element_type=jnp.float32)
    h = jnp.maximum(h + b2_ref[...], 0.0)

    h = jnp.dot(h.astype(jnp.bfloat16), w3_ref[...], preferred_element_type=jnp.float32)
    h = jnp.maximum(h + b3_ref[...], 0.0)

    out = jnp.dot(h.astype(jnp.bfloat16), w4_ref[...], preferred_element_type=jnp.float32)
    o_ref[...] = (out + b4_ref[...]).astype(o_ref.dtype)


def _round_up(x, m):
    return (x + m - 1) // m * m


def action_nn_forward(x, params):
    """x: [B, inputs] float32; params: f32 dict from init_params (weights stored [in, out])."""
    B, inputs = x.shape
    outputs = params["w4"].shape[1]

    # --- wrapper-side dtype / layout prep (done once, not per tile) ---
    x_bf16 = x.astype(jnp.bfloat16)
    w1 = params["w1"].astype(jnp.bfloat16)
    w2 = params["w2"].astype(jnp.bfloat16)
    w3 = params["w3"].astype(jnp.bfloat16)
    # Pad the last layer to a lane-dense 128-wide slab; padded columns are zero.
    w4 = jnp.zeros((HIDDEN, OUT_PAD), jnp.bfloat16).at[:, :outputs].set(
        params["w4"].astype(jnp.bfloat16))
    b1, b2, b3 = params["b1"], params["b2"], params["b3"]
    b4 = jnp.zeros((1, OUT_PAD), jnp.float32).at[:, :outputs].set(params["b4"])

    # --- batch tiling: TM rows per step, batch padded to a multiple of TM ---
    tm = min(MAX_TM, _round_up(B, 8))
    b_pad = _round_up(B, tm)
    if b_pad != B:
        x_bf16 = jnp.pad(x_bf16, ((0, b_pad - B), (0, 0)))
    grid = (b_pad // tm,)

    const = lambda i: (0, 0)   # weights/biases: fetched once, resident across the grid
    in_specs = [
        pl.BlockSpec((tm, inputs), lambda i: (i, 0)),   # x tile
        pl.BlockSpec((inputs, HIDDEN), const),          # w1
        pl.BlockSpec((1, HIDDEN), const),               # b1
        pl.BlockSpec((HIDDEN, HIDDEN), const),          # w2
        pl.BlockSpec((1, HIDDEN), const),               # b2
        pl.BlockSpec((HIDDEN, HIDDEN), const),          # w3
        pl.BlockSpec((1, HIDDEN), const),               # b3
        pl.BlockSpec((HIDDEN, OUT_PAD), const),         # w4 (lane-padded)
        pl.BlockSpec((1, OUT_PAD), const),              # b4 (lane-padded)
    ]
    out_spec = pl.BlockSpec((tm, OUT_PAD), lambda i: (i, 0))

    flops = 2 * b_pad * (inputs * HIDDEN + 2 * HIDDEN * HIDDEN + HIDDEN * OUT_PAD)
    weight_bytes = (inputs * HIDDEN + 2 * HIDDEN * HIDDEN + HIDDEN * OUT_PAD) * 2 \
                   + (3 * HIDDEN + OUT_PAD) * 4
    bytes_accessed = b_pad * inputs * 2 + b_pad * OUT_PAD * 4 + weight_bytes

    out_padded = pl.pallas_call(
        _mlp_kernel,
        out_shape=jax.ShapeDtypeStruct((b_pad, OUT_PAD), jnp.float32),
        grid=grid,
        in_specs=in_specs,
        out_specs=out_spec,
        compiler_params=pltpu.CompilerParams(
            dimension_semantics=("parallel",)),   # shard batch tiles across TCs on v7x
        cost_estimate=pl.CostEstimate(
            flops=flops, transcendentals=0, bytes_accessed=bytes_accessed),
    )(x_bf16, w1, b1, w2, b2, w3, b3, w4, b4)

    return out_padded[:B, :outputs]


def init_params(key, inputs, outputs):
    """Deterministic init mimicking nn.Linear default (uniform +/- 1/sqrt(fan_in)).
    Weights stored as [in, out] (transpose of PyTorch's [out, in]); biases as (1, out)."""
    dims = [(inputs, HIDDEN), (HIDDEN, HIDDEN), (HIDDEN, HIDDEN), (HIDDEN, outputs)]
    params = {}
    for idx, (fan_in, fan_out) in enumerate(dims, start=1):
        key, kw, kb = jax.random.split(key, 3)
        bound = 1.0 / jnp.sqrt(float(fan_in))
        params[f"w{idx}"] = jax.random.uniform(
            kw, (fan_in, fan_out), jnp.float32, -bound, bound)
        params[f"b{idx}"] = jax.random.uniform(
            kb, (1, fan_out), jnp.float32, -bound, bound)
    return params


def reference_forward(x, params):
    """Pure-JAX reference mirroring the kernel numerics (bf16 operands, f32 accumulate)."""
    h = x.astype(jnp.bfloat16)
    for idx in range(1, 4):
        w = params[f"w{idx}"].astype(jnp.bfloat16)
        h = jnp.maximum(
            jnp.dot(h, w, preferred_element_type=jnp.float32) + params[f"b{idx}"], 0.0)
        h = h.astype(jnp.bfloat16)
    w4 = params["w4"].astype(jnp.bfloat16)
    return jnp.dot(h, w4, preferred_element_type=jnp.float32) + params["b4"]


if __name__ == "__main__":
    key = jax.random.PRNGKey(0)
    inputs, outputs = 8, 4

    kp, kx1, kx2 = jax.random.split(key, 3)
    params = init_params(kp, inputs, outputs)

    # Small-batch check (single grid step).
    x_small = jax.random.normal(kx1, (2, inputs), jnp.float32)
    out_small = jax.block_until_ready(action_nn_forward(x_small, params))
    ref_small = reference_forward(x_small, params)
    assert out_small.shape == (2, outputs)
    assert jnp.allclose(out_small, ref_small, atol=1e-4, rtol=1e-4), "small-batch mismatch"

    # Larger-batch check (exercises padding + multi-step pipelined grid).
    x_big = jax.random.normal(kx2, (530, inputs), jnp.float32)
    out_big = jax.block_until_ready(action_nn_forward(x_big, params))
    ref_big = reference_forward(x_big, params)
    assert out_big.shape == (530, outputs)
    assert jnp.allclose(out_big, ref_big, atol=1e-4, rtol=1e-4), "big-batch mismatch"

    print("KERNEL_OK")
</pallas_src>

<mosaic_0001>
module attributes {stable_mosaic.version = 11 : i64} {
  func.func @_mlp_kernel(%arg0: i32, %arg1: memref<8x8xbf16, #tpu.memory_space<vmem>>, %arg2: memref<8x32xbf16, #tpu.memory_space<vmem>>, %arg3: memref<1x32xf32, #tpu.memory_space<vmem>>, %arg4: memref<32x32xbf16, #tpu.memory_space<vmem>>, %arg5: memref<1x32xf32, #tpu.memory_space<vmem>>, %arg6: memref<32x32xbf16, #tpu.memory_space<vmem>>, %arg7: memref<1x32xf32, #tpu.memory_space<vmem>>, %arg8: memref<32x128xbf16, #tpu.memory_space<vmem>>, %arg9: memref<1x128xf32, #tpu.memory_space<vmem>>, %arg10: memref<8x128xf32, #tpu.memory_space<vmem>>) attributes {dimension_semantics = [#tpu.dimension_semantics<parallel>], iteration_bounds = array<i64: 1>, scalar_prefetch = 0 : i64, scratch_operands = 0 : i64, tpu.core_type = #tpu.core_type<tc>, window_params = [{transform_indices = @transform_0, window_bounds = array<i64: 8, 8>}, {pipeline_mode = #tpu.pipeline_mode<synchronous>, transform_indices = @transform_1, window_bounds = array<i64: 8, 32>}, {pipeline_mode = #tpu.pipeline_mode<synchronous>, transform_indices = @transform_2, window_bounds = array<i64: 1, 32>}, {pipeline_mode = #tpu.pipeline_mode<synchronous>, transform_indices = @transform_3, window_bounds = array<i64: 32, 32>}, {pipeline_mode = #tpu.pipeline_mode<synchronous>, transform_indices = @transform_4, window_bounds = array<i64: 1, 32>}, {pipeline_mode = #tpu.pipeline_mode<synchronous>, transform_indices = @transform_5, window_bounds = array<i64: 32, 32>}, {pipeline_mode = #tpu.pipeline_mode<synchronous>, transform_indices = @transform_6, window_bounds = array<i64: 1, 32>}, {pipeline_mode = #tpu.pipeline_mode<synchronous>, transform_indices = @transform_7, window_bounds = array<i64: 32, 128>}, {pipeline_mode = #tpu.pipeline_mode<synchronous>, transform_indices = @transform_8, window_bounds = array<i64: 1, 128>}, {transform_indices = @transform_9, window_bounds = array<i64: 8, 128>}]} {
    %c0 = arith.constant 0 : index
    %c0_0 = arith.constant 0 : index
    %0 = vector.load %arg1[%c0, %c0_0] : memref<8x8xbf16, #tpu.memory_space<vmem>>, vector<8x8xbf16>
    %c0_1 = arith.constant 0 : index
    %c0_2 = arith.constant 0 : index
    %1 = vector.load %arg2[%c0_1, %c0_2] : memref<8x32xbf16, #tpu.memory_space<vmem>>, vector<8x32xbf16>
    %cst = arith.constant dense<0.000000e+00> : vector<8x32xf32>
    %2 = tpu.matmul %0, %1, %cst {dimension_numbers = #tpu.dot_dimension_numbers<[1], [0], [0], [1], [0, 0, 1, 1], [], []>} : vector<8x8xbf16>, vector<8x32xbf16>, vector<8x32xf32> -> vector<8x32xf32>
    %c0_3 = arith.constant 0 : index
    %c0_4 = arith.constant 0 : index
    %3 = vector.load %arg3[%c0_3, %c0_4] : memref<1x32xf32, #tpu.memory_space<vmem>>, vector<1x32xf32>
    %4 = vector.broadcast %3 : vector<1x32xf32> to vector<8x32xf32>
    %5 = arith.addf %2, %4 : vector<8x32xf32>
    %cst_5 = arith.constant 0.000000e+00 : f32
    %6 = vector.broadcast %cst_5 : f32 to vector<8x32xf32>
    %7 = arith.maximumf %5, %6 : vector<8x32xf32>
    %8 = arith.truncf %7 : vector<8x32xf32> to vector<8x32xbf16>
    %c0_6 = arith.constant 0 : index
    %c0_7 = arith.constant 0 : index
    %9 = vector.load %arg4[%c0_6, %c0_7] : memref<32x32xbf16, #tpu.memory_space<vmem>>, vector<32x32xbf16>
    %cst_8 = arith.constant dense<0.000000e+00> : vector<8x32xf32>
    %10 = tpu.matmul %8, %9, %cst_8 {dimension_numbers = #tpu.dot_dimension_numbers<[1], [0], [0], [1], [0, 0, 1, 1], [], []>} : vector<8x32xbf16>, vector<32x32xbf16>, vector<8x32xf32> -> vector<8x32xf32>
    %c0_9 = arith.constant 0 : index
    %c0_10 = arith.constant 0 : index
    %11 = vector.load %arg5[%c0_9, %c0_10] : memref<1x32xf32, #tpu.memory_space<vmem>>, vector<1x32xf32>
    %12 = vector.broadcast %11 : vector<1x32xf32> to vector<8x32xf32>
    %13 = arith.addf %10, %12 : vector<8x32xf32>
    %cst_11 = arith.constant 0.000000e+00 : f32
    %14 = vector.broadcast %cst_11 : f32 to vector<8x32xf32>
    %15 = arith.maximumf %13, %14 : vector<8x32xf32>
    %16 = arith.truncf %15 : vector<8x32xf32> to vector<8x32xbf16>
    %c0_12 = arith.constant 0 : index
    %c0_13 = arith.constant 0 : index
    %17 = vector.load %arg6[%c0_12, %c0_13] : memref<32x32xbf16, #tpu.memory_space<vmem>>, vector<32x32xbf16>
    %cst_14 = arith.constant dense<0.000000e+00> : vector<8x32xf32>
    %18 = tpu.matmul %16, %17, %cst_14 {dimension_numbers = #tpu.dot_dimension_numbers<[1], [0], [0], [1], [0, 0, 1, 1], [], []>} : vector<8x32xbf16>, vector<32x32xbf16>, vector<8x32xf32> -> vector<8x32xf32>
    %c0_15 = arith.constant 0 : index
    %c0_16 = arith.constant 0 : index
    %19 = vector.load %arg7[%c0_15, %c0_16] : memref<1x32xf32, #tpu.memory_space<vmem>>, vector<1x32xf32>
    %20 = vector.broadcast %19 : vector<1x32xf32> to vector<8x32xf32>
    %21 = arith.addf %18, %20 : vector<8x32xf32>
    %cst_17 = arith.constant 0.000000e+00 : f32
    %22 = vector.broadcast %cst_17 : f32 to vector<8x32xf32>
    %23 = arith.maximumf %21, %22 : vector<8x32xf32>
    %24 = arith.truncf %23 : vector<8x32xf32> to vector<8x32xbf16>
    %c0_18 = arith.constant 0 : index
    %c0_19 = arith.constant 0 : index
    %25 = vector.load %arg8[%c0_18, %c0_19] : memref<32x128xbf16, #tpu.memory_space<vmem>>, vector<32x128xbf16>
    %cst_20 = arith.constant dense<0.000000e+00> : vector<8x128xf32>
    %26 = tpu.matmul %24, %25, %cst_20 {dimension_numbers = #tpu.dot_dimension_numbers<[1], [0], [0], [1], [0, 0, 1, 1], [], []>} : vector<8x32xbf16>, vector<32x128xbf16>, vector<8x128xf32> -> vector<8x128xf32>
    %c0_21 = arith.constant 0 : index
    %c0_22 = arith.constant 0 : index
    %27 = vector.load %arg9[%c0_21, %c0_22] : memref<1x128xf32, #tpu.memory_space<vmem>>, vector<1x128xf32>
    %28 = vector.broadcast %27 : vector<1x128xf32> to vector<8x128xf32>
    %29 = arith.addf %26, %28 : vector<8x128xf32>
    %c0_23 = arith.constant 0 : index
    %c0_24 = arith.constant 0 : index
    %30 = vector.load %arg10[%c0_23, %c0_24] : memref<8x128xf32, #tpu.memory_space<vmem>>, vector<8x128xf32>
    tpu.vector_store %arg10[%c0_23, %c0_24], %29 {strides = array<i32>} : memref<8x128xf32, #tpu.memory_space<vmem>>, vector<8x128xf32>,
    return
  }
  func.func @transform_0(%arg0: i32) -> (i32, i32) {
    %c0_i32 = arith.constant 0 : i32
    %c0_i32_0 = arith.constant 0 : i32
    return %arg0, %c0_i32 : i32, i32
  }
  func.func @transform_1(%arg0: i32) -> (i32, i32) {
    %c0_i32 = arith.constant 0 : i32
    %c0_i32_0 = arith.constant 0 : i32
    %c0_i32_1 = arith.constant 0 : i32
    return %c0_i32, %c0_i32_0 : i32, i32
  }
  func.func @transform_2(%arg0: i32) -> (i32, i32) {
    %c0_i32 = arith.constant 0 : i32
    %c0_i32_0 = arith.constant 0 : i32
    %c0_i32_1 = arith.constant 0 : i32
    return %c0_i32, %c0_i32_0 : i32, i32
  }
  func.func @transform_3(%arg0: i32) -> (i32, i32) {
    %c0_i32 = arith.constant 0 : i32
    %c0_i32_0 = arith.constant 0 : i32
    %c0_i32_1 = arith.constant 0 : i32
    return %c0_i32, %c0_i32_0 : i32, i32
  }
  func.func @transform_4(%arg0: i32) -> (i32, i32) {
    %c0_i32 = arith.constant 0 : i32
    %c0_i32_0 = arith.constant 0 : i32
    %c0_i32_1 = arith.constant 0 : i32
    return %c0_i32, %c0_i32_0 : i32, i32
  }
  func.func @transform_5(%arg0: i32) -> (i32, i32) {
    %c0_i32 = arith.constant 0 : i32
    %c0_i32_0 = arith.constant 0 : i32
    %c0_i32_1 = arith.constant 0 : i32
    return %c0_i32, %c0_i32_0 : i32, i32
  }
  func.func @transform_6(%arg0: i32) -> (i32, i32) {
    %c0_i32 = arith.constant 0 : i32
    %c0_i32_0 = arith.constant 0 : i32
    %c0_i32_1 = arith.constant 0 : i32
    return %c0_i32, %c0_i32_0 : i32, i32
  }
  func.func @transform_7(%arg0: i32) -> (i32, i32) {
    %c0_i32 = arith.constant 0 : i32
    %c0_i32_0 = arith.constant 0 : i32
    %c0_i32_1 = arith.constant 0 : i32
    return %c0_i32, %c0_i32_0 : i32, i32
  }
  func.func @transform_8(%arg0: i32) -> (i32, i32) {
    %c0_i32 = arith.constant 0 : i32
    %c0_i32_0 = arith.constant 0 : i32
    %c0_i32_1 = arith.constant 0 : i32
    return %c0_i32, %c0_i32_0 : i32, i32
  }
  func.func @transform_9(%arg0: i32) -> (i32, i32) {
    %c0_i32 = arith.constant 0 : i32
    %c0_i32_0 = arith.constant 0 : i32
    return %arg0, %c0_i32 : i32, i32
  }
}

</mosaic_0001>

<bundles_post_ra>
// kernel: tpu_custom_call.1
= control target key start
LH: loop header
LB: loop body
LE: loop exit
PB: predicated region body
PF: predicated region fallthrough
CT: control target
= control target key end

     0   :  { %14 = vsyncpa [#allocation3], 0  ;;  %s697_s0 = inlined_call_operand.hbm [shape: bf16[8,8], index: 0, kind: input, shape index: {}]   ;;  %s698_s1 = inlined_call_operand.hbm [shape: bf16[8,32], index: 1, kind: input, shape index: {}]   ;;  %s699_s2 = inlined_call_operand.vmem [shape: f32[1,32], index: 2, kind: input, shape index: {}]   ;;  %s700_s3 = inlined_call_operand.hbm [shape: bf16[32,32], index: 3, kind: input, shape index: {}]   ;;  %s701_s4 = inlined_call_operand.vmem [shape: f32[1,32], index: 4, kind: input, shape index: {}]   ;;  %s702_s5 = inlined_call_operand.vmem [shape: bf16[32,32], index: 5, kind: input, shape index: {}]   ;;  %s703_s6 = inlined_call_operand.vmem [shape: f32[1,32], index: 6, kind: input, shape index: {}]   ;;  %s704_s7 = inlined_call_operand.hbm [shape: bf16[32,128], index: 7, kind: input, shape index: {}]   ;;  %s705_s8 = inlined_call_operand.vmem [shape: f32[1,128], index: 8, kind: input, shape index: {}]   ;;  %s706_s9 = inlined_call_operand.hbm [shape: f32[8,128], index: 9, kind: output, shape index: {}]  }
   0x1   :  { %15 = vsyncpa [#allocation6], 0 }
   0x2   :  { %16 = vsyncpa [#allocation9], 0 }
   0x3   :  { %17 = vsyncpa [#allocation4], 0  ;;  %s553_s30 = smov [#allocation5]   ;;  %s554_s11 = smov [#allocation2]  }
   0x4   :  { %s34_s10 = sshll.u32 %s553_s30, 4  ;;  %s24_s12 = sshll.u32 %s554_s11, 4  ;;  %s35_s10 = int_to_ptr.vmem [resolvable:$true] %s34_s10  ;;  %s25_s12 = int_to_ptr.vmem [resolvable:$true] %s24_s12 }
   0x5   :  { %s435_s15 = scalar_lea.hbm %s698_s1, 64 }
   0x6   :  { %p436_p0 = scmp.ne.s32.totalorder %s698_s1, %s435_s15  ;;  %p439_p1 = scmp.lt.u32.totalorder %s435_s15, %s698_s1 }
   0x8   :  { %p441_p2 = pnand %p439_p1, %p436_p0 }
   0xa   :  { %444 = shalt.err (!%p441_p2)
}
   0xb   :  { %s445_s20 = scalar_lea.vmem %s35_s10, 64  ;;  %p450_p4 = scmp.lt.s32.totalorder %s35_s10, %s35_s10 }
   0xc   :  { %p446_p3 = scmp.ne.s32.totalorder %s35_s10, %s445_s20  ;;  %p451_p5 = scmp.lt.s32.totalorder %s445_s20, %s445_s20 }
   0xe   :  { %p452_p6 = por %p451_p5, %p450_p4 }
  0x10   :  { %p453_p7 = pnand %p452_p6, %p446_p3 }
  0x12   :  { %456 = shalt.err (!%p453_p7)
}
  0x13   :  { %37 = dma.hbm_to_vmem [thread:$0]  %s698_s1, 64, %s35_s10, [#allocation6]  }
  0x14   :  { %s457_s25 = scalar_lea.hbm %s697_s0, 64 }
  0x15   :  { %p458_p8 = scmp.ne.s32.totalorder %s697_s0, %s457_s25  ;;  %p461_p9 = scmp.lt.u32.totalorder %s457_s25, %s697_s0 }
  0x17   :  { %p463_p10 = pnand %p461_p9, %p458_p8 }
  0x19   :  { %466 = shalt.err (!%p463_p10)
}
  0x1a   :  { %s467_s30 = scalar_lea.vmem %s25_s12, 64  ;;  %p472_p12 = scmp.lt.s32.totalorder %s25_s12, %s25_s12 }
  0x1b   :  { %p468_p11 = scmp.ne.s32.totalorder %s25_s12, %s467_s30  ;;  %p473_p13 = scmp.lt.s32.totalorder %s467_s30, %s467_s30 }
  0x1d   :  { %p474_p0 = por %p473_p13, %p472_p12 }
  0x1f   :  { %p475_p1 = pnand %p474_p0, %p468_p11 }
  0x21   :  { %478 = shalt.err (!%p475_p1)
}
  0x22   :  { %27 = dma.hbm_to_vmem [thread:$0]  %s697_s0, 64, %s25_s12, [#allocation3]  }
  0x23   :  { %s555_s11 = smov [#allocation7]   ;;  %s479_s16 = scalar_lea.hbm %s700_s3, 256 }
  0x24   :  { %s45_s13 = sshll.u32 %s555_s11, 4  ;;  %p480_p2 = scmp.ne.s32.totalorder %s700_s3, %s479_s16  ;;  %s46_s13 = int_to_ptr.vmem [resolvable:$true] %s45_s13 }
  0x25   :  { %p483_p3 = scmp.lt.u32.totalorder %s479_s16, %s700_s3 }
  0x27   :  { %p485_p4 = pnand %p483_p3, %p480_p2 }
  0x29   :  { %488 = shalt.err (!%p485_p4)
}
  0x2a   :  { %s489_s21 = scalar_lea.vmem %s46_s13, 256  ;;  %p494_p6 = scmp.lt.s32.totalorder %s46_s13, %s46_s13 }
  0x2b   :  { %p490_p5 = scmp.ne.s32.totalorder %s46_s13, %s489_s21  ;;  %p495_p7 = scmp.lt.s32.totalorder %s489_s21, %s489_s21 }
  0x2d   :  { %p496_p8 = por %p495_p7, %p494_p6 }
  0x2f   :  { %p497_p9 = pnand %p496_p8, %p490_p5 }
  0x31   :  { %500 = shalt.err (!%p497_p9)
}
  0x32   :  { %s556_s0 = smov 64   ;;  %s557_s12 = smov 4  }
  0x33   :  { %51 = dma.hbm_to_vmem [thread:$0]  %s700_s3, 256, %s46_s13, [#allocation6], %s556_s0, %s556_s0, %s557_s12  }
  0x34   :  { %s558_s24 = smov [#allocation8]   ;;  %s501_s28 = scalar_lea.hbm %s704_s7, 256 }
  0x35   :  { %s63_s25 = sshll.u32 %s558_s24, 4  ;;  %p502_p10 = scmp.ne.s32.totalorder %s704_s7, %s501_s28  ;;  %s64_s25 = int_to_ptr.vmem [resolvable:$true] %s63_s25 }
  0x36   :  { %p505_p11 = scmp.lt.u32.totalorder %s501_s28, %s704_s7 }
  0x38   :  { %p507_p12 = pnand %p505_p11, %p502_p10 }
  0x3a   :  { %510 = shalt.err (!%p507_p12)
}
  0x3b   :  { %s511_s11 = scalar_lea.vmem %s64_s25, 256  ;;  %p516_p0 = scmp.lt.s32.totalorder %s64_s25, %s64_s25 }
  0x3c   :  { %p512_p13 = scmp.ne.s32.totalorder %s64_s25, %s511_s11  ;;  %p517_p1 = scmp.lt.s32.totalorder %s511_s11, %s511_s11 }
  0x3e   :  { %p518_p2 = por %p517_p1, %p516_p0 }
  0x40   :  { %p519_p3 = pnand %p518_p2, %p512_p13 }
  0x42   :  { %522 = shalt.err (!%p519_p3)
}
  0x43   :  { %69 = dma.hbm_to_vmem [thread:$0]  %s704_s7, 256, %s64_s25, [#allocation9], %s556_s0, %s556_s0, %s557_s12  }
  0x44   :  { %545 = dma.done.wait [#allocation3], 64  }
  0x45   :  { %546 = vsyncadd [#allocation3], 4294967232 }
  0x46   :  { %547 = dma.done.wait [#allocation6], 320  }
  0x47   :  { %548 = vsyncadd [#allocation6], 4294966976 }
  0x48   :  { %549 = dma.done.wait [#allocation9], 256  }
  0x49   :  { %550 = vsyncadd [#allocation9], 4294967040  ;;  %v559_v0 = vmov 0.0   ;;  %vm560_vm0 = vmmov 0   ;;  %vm98_vm1 = vcmask 1043456   ;;  %vm94_vm2 = vcmask 64512  }
  0x4a   :  { %390 = vmatprep.subr.bf16.mxu0 %v559_v0  ;;  %392 = vmatprep.mubr.msk.bf16.mxu0 %vm560_vm0, %v559_v0  ;;  %v86_v1 = vld [vmem:[#allocation5] sm:$0xf]  ;;  %v85_v2 = vld [vmem:[#allocation2] sm:$0xf]  ;;  %v429_v4 = vld [vmem:[#allocation7] sm:$0xff]   ;;  %vm167_vm3 = vcmask 261120  }
  0x4b   :  { %396 = vmatprep.subr.bf16.mxu1 %v559_v0  ;;  %400 = vmatprep.mubr.msk.bf16.mxu1 %vm560_vm0, %v559_v0  ;;  %v100_v3 = vsel %vm98_vm1, %v86_v1, 0  ;;  %v430_v5 = vld [vmem:[#allocation7 + $0x8] sm:$0xff]   ;;  %v432_v15 = vld [vmem:[%s702_s5 + $0x8] sm:$0xff]   ;;  %v434_v25 = vld [vmem:[#allocation8 + $0x8] sm:$0xff]   ;;  %s561_s0 = smov [#allocation10]  }
  0x4c   :  { %391 = vmatpush3.bf16.msra.mxu0 %v100_v3  ;;  %397 = vmatpush3.bf16.msra.mxu1 %v429_v4  ;;  %v431_v6 = vld [vmem:[%s702_s5] sm:$0xff]   ;;  %v433_v16 = vld [vmem:[#allocation8] sm:$0xff]   ;;  %s354_s12 = sshll.u32 %s561_s0, 4  ;;  %s355_s12 = int_to_ptr.vmem [resolvable:$true] %s354_s12 }
  0x4d   :  { %404 = vmatprep.subr.bf16.mxu0 %v559_v0  ;;  %398 = vmatprep.subr.bf16.mxu1 %v559_v0  ;;  %v365_v7 = vld [vmem:[%s699_s2] ss:$0 sm:$0xff]  ;;  %p528_p5 = scmp.lt.s32.totalorder %s355_s12, %s355_s12 }
  0x4e   :  { %v367_v17 = vld [vmem:[%s701_s4] ss:$0 sm:$0xff] }
  0x4f   :  { %393 = vmatmul.mubr.msk.bf16.vlgmr.msra.gmra.mrb[0].mxu0 %vm94_vm2, %v85_v2  ;;  %v371_v26 = vld [vmem:[%s703_s6] ss:$0 sm:$0xff]  ;;  %s523_s6 = scalar_lea.vmem %s355_s12, 128 }
  0x50   :  { %408 = vmatprep.mubr.msk.bf16.mxu0 %vm560_vm0, %v559_v0  ;;  %399 = vmatpush3.bf16.msra.mxu1 %v430_v5  ;;  %v375_v34 = vld [vmem:[%s705_s8] ss:$0 sm:$0xff]  ;;  %p524_p4 = scmp.ne.s32.totalorder %s355_s12, %s523_s6  ;;  %p529_p6 = scmp.lt.s32.totalorder %s523_s6, %s523_s6 }
  0x51   :  { %412 = vmatprep.subr.bf16.mxu1 %v559_v0  ;;  %405 = vmatpush3.bf16.msra.mxu0 %v431_v6 }
  0x52   :  { %406 = vmatprep.subr.bf16.mxu0 %v559_v0  ;;  %p530_p7 = por %p529_p6, %p528_p5 }
  0x54   :  { %p531_p8 = pnand %p530_p7, %p524_p4 }
  0x55   :  { %407 = vmatpush3.bf16.msra.mxu0 %v432_v15 }
 0x122   :  { %v136_v8 = vpop.f32.mrb[0].mxu0 }
 0x123   :  { %v137_v9 = vadd.f32 %v365_v7, %v136_v8  ;;  %v394_v10 = vpop.f32.mrb[1].mxu0 }
 0x124   :  { %v139_v11 = vpop.f32.mrb[2].mxu0 }
 0x125   :  { %v142_v12 = vmax.f32 %v137_v9, 0.0  ;;  %v395_v13 = vpop.f32.mrb[3].mxu0 }
 0x127   :  { %v143_v14 = vpack.c.bf16 %v142_v12, %v142_v12 }
 0x129   :  { %401 = vmatmul.mubr.msk.bf16.vlgmr.msra.gmra.mrb[0].mxu1 %vm167_vm3, %v143_v14 }
 0x12a   :  { %416 = vmatprep.mubr.msk.bf16.mxu1 %vm560_vm0, %v559_v0  ;;  %413 = vmatpush3.bf16.msra.mxu1 %v433_v16 }
 0x12b   :  { %414 = vmatprep.subr.bf16.mxu1 %v559_v0 }
 0x12e   :  { %415 = vmatpush3.bf16.msra.mxu1 %v434_v25 }
 0x1fc   :  { %v205_v18 = vpop.f32.mrb[0].mxu1 }
 0x1fd   :  { %v206_v19 = vadd.f32 %v367_v17, %v205_v18  ;;  %v402_v20 = vpop.f32.mrb[1].mxu1 }
 0x1fe   :  { %v208_v21 = vpop.f32.mrb[2].mxu1 }
 0x1ff   :  { %v211_v22 = vmax.f32 %v206_v19, 0.0  ;;  %v403_v23 = vpop.f32.mrb[3].mxu1 }
 0x201   :  { %v212_v24 = vpack.c.bf16 %v211_v22, %v211_v22 }
 0x203   :  { %409 = vmatmul.mubr.msk.bf16.vlgmr.msra.gmra.mrb[4].mxu0 %vm167_vm3, %v212_v24 }
 0x2d6   :  { %v273_v27 = vpop.f32.mrb[4].mxu0 }
 0x2d7   :  { %v274_v28 = vadd.f32 %v371_v26, %v273_v27  ;;  %v410_v29 = vpop.f32.mrb[5].mxu0 }
 0x2d8   :  { %v276_v30 = vpop.f32.mrb[6].mxu0 }
 0x2d9   :  { %v279_v31 = vmax.f32 %v274_v28, 0.0  ;;  %v411_v32 = vpop.f32.mrb[7].mxu0 }
 0x2db   :  { %v280_v33 = vpack.c.bf16 %v279_v31, %v279_v31 }
 0x2dd   :  { %417 = vmatmul.mubr.msk.bf16.vlgmr.msra.gmra.mrb[4].mxu1 %vm167_vm3, %v280_v33 }
 0x3b0   :  { %v341_v35 = vpop.f32.mrb[4].mxu1 }
 0x3b1   :  { %v342_v36 = vadd.f32 %v375_v34, %v341_v35  ;;  %v418_v37 = vpop.f32.mrb[5].mxu1 }
 0x3b2   :  { %v344_v38 = vpop.f32.mrb[6].mxu1 }
 0x3b3   :  { %347 = vst [vmem:[#allocation10] sm:$0xff] %v342_v36  ;;  %v419_v39 = vpop.f32.mrb[7].mxu1 }
 0x3b4   :  { %534 = shalt.err (!%p531_p8)
}
 0x3b5   :  { %s535_s8 = scalar_lea.hbm %s706_s9, 128 }
 0x3b6   :  { %p536_p9 = scmp.ne.s32.totalorder %s706_s9, %s535_s8  ;;  %p539_p10 = scmp.lt.u32.totalorder %s535_s8, %s706_s9 }
 0x3b8   :  { %p541_p11 = pnand %p539_p10, %p536_p9 }
 0x3ba   :  { %544 = shalt.err (!%p541_p11)
}
 0x3bb   :  { %357 = dma.vmem_to_hbm [thread:$0]  %s355_s12, 128, %s706_s9, [#allocation4]  }
 0x3bc   :  { %551 = dma.done.wait [#allocation4], 128  }
 0x3bd   :  { %552 = vsyncadd [#allocation4], 4294967168 }
 0x3be   :  { %361 = vsyncpa [#allocation3], 1 }
 0x3bf   :  { %362 = vsyncpa [#allocation6], 1 }
 0x3c0   :  { %363 = vsyncpa [#allocation9], 1 }
 0x3c1   :  { %364 = vsyncpa [#allocation4], 1 }

</bundles_post_ra>
